<compile_context>
chip_gen: v6e
topology: v6e:2x2x1
jax: 0.10.0
libtpu: 0.0.40
codegen_flags: <defaults>
</compile_context>

<pallas_src>
import jax
import jax.numpy as jnp
from jax import lax
from jax.experimental import pallas as pl
from jax.experimental.pallas import tpu as pltpu


def _round_up(n, m):
    return ((n + m - 1) // m) * m


def _linear_kernel(x_ref, w_ref, b_ref, o_ref):
    # x_ref: [TM, H], w_ref: [dout, H] (PyTorch layout), b_ref: [1, dout].
    # Contract along the hidden axis on the MXU with an f32 accumulator.
    acc = lax.dot_general(
        x_ref[...], w_ref[...],
        dimension_numbers=(((1,), (1,)), ((), ())),
        preferred_element_type=jnp.float32,
    )
    acc = acc + b_ref[...].astype(jnp.float32)
    o_ref[...] = acc.astype(o_ref.dtype)


def q_net_forward(x, weight, bias, *, block_rows=512):
    """Pallas equivalent of Q_Net.forward.

    Args:
      x:      [B, hidden_dim]
      weight: [dout, hidden_dim]   (PyTorch nn.Linear layout — NOT transposed)
      bias:   [dout] or [1, dout]
      block_rows: batch-tile size (rounded to a multiple of 8 internally).
    Returns:
      q:      [B, dout]
    """
    B, hidden_dim = x.shape
    dout, h2 = weight.shape
    assert h2 == hidden_dim, "weight hidden_dim mismatch"

    # Free metadata reshape; store bias 2-D in params to skip it entirely.
    if bias.ndim == 1:
        bias = bias.reshape(1, dout)

    # Batch tile: multiple of 8 (sublane), capped so double-buffered x tiles
    # stay tiny relative to scoped VMEM on every generation.
    tm = min(_round_up(block_rows, 8), _round_up(B, 8))
    b_pad = _round_up(B, tm)
    x_in = x if b_pad == B else jnp.pad(x, ((0, b_pad - B), (0, 0)))

    grid = (b_pad // tm,)

    out = pl.pallas_call(
        _linear_kernel,
        out_shape=jax.ShapeDtypeStruct((b_pad, dout), x.dtype),
        grid=grid,
        in_specs=[
            pl.BlockSpec((tm, hidden_dim), lambda i: (i, 0)),     # x tile
            pl.BlockSpec((dout, hidden_dim), lambda i: (0, 0)),   # weight (resident)
            pl.BlockSpec((1, dout), lambda i: (0, 0)),            # bias (resident)
        ],
        out_specs=pl.BlockSpec((tm, dout), lambda i: (i, 0)),
        compiler_params=pltpu.CompilerParams(
            dimension_semantics=("parallel",)),
    )(x_in, weight, bias)

    return out if b_pad == B else out[:B]


def init_q_net_params(key, hidden_dim, dout, dtype=jnp.float32):
    """Deterministic synthetic init matching nn.Linear(hidden_dim, dout) shapes."""
    kw, kb = jax.random.split(key)
    bound = 1.0 / (hidden_dim ** 0.5)
    weight = jax.random.uniform(kw, (dout, hidden_dim), dtype,
                                minval=-bound, maxval=bound)
    bias = jax.random.uniform(kb, (dout,), dtype, minval=-bound, maxval=bound)
    return weight, bias


if __name__ == "__main__":
    key = jax.random.PRNGKey(0)
    kx, kp = jax.random.split(key)

    batch = 24         # e.g. batch * n_agents rows
    hidden_dim = 32
    dout = 8           # number of actions

    x = jax.random.normal(kx, (batch, hidden_dim), jnp.float32)
    weight, bias = init_q_net_params(kp, hidden_dim, dout)

    q_ref = x @ weight.T + bias

    # Single-block path (tm covers the whole batch).
    q = q_net_forward(x, weight, bias)
    jax.block_until_ready(q)
    assert q.shape == (batch, dout)
    assert jnp.allclose(q, q_ref, atol=1e-5, rtol=1e-5), "mismatch (single block)"

    # Tiled path (grid = 3 batch tiles of 8 rows) to exercise the pipeline.
    q_tiled = q_net_forward(x, weight, bias, block_rows=8)
    jax.block_until_ready(q_tiled)
    assert jnp.allclose(q_tiled, q_ref, atol=1e-5, rtol=1e-5), "mismatch (tiled)"

    print("KERNEL_OK")
</pallas_src>

<mosaic_0001>
module attributes {stable_mosaic.version = 11 : i64} {
  func.func @_linear_kernel(%arg0: i32, %arg1: memref<24x32xf32, #tpu.memory_space<vmem>>, %arg2: memref<8x32xf32, #tpu.memory_space<vmem>>, %arg3: memref<1x8xf32, #tpu.memory_space<vmem>>, %arg4: memref<24x8xf32, #tpu.memory_space<vmem>>) attributes {dimension_semantics = [#tpu.dimension_semantics<parallel>], iteration_bounds = array<i64: 1>, scalar_prefetch = 0 : i64, scratch_operands = 0 : i64, tpu.core_type = #tpu.core_type<tc>, window_params = [{transform_indices = @transform_0, window_bounds = array<i64: 24, 32>}, {pipeline_mode = #tpu.pipeline_mode<synchronous>, transform_indices = @transform_1, window_bounds = array<i64: 8, 32>}, {pipeline_mode = #tpu.pipeline_mode<synchronous>, transform_indices = @transform_2, window_bounds = array<i64: 1, 8>}, {transform_indices = @transform_3, window_bounds = array<i64: 24, 8>}]} {
    %c0 = arith.constant 0 : index
    %c0_0 = arith.constant 0 : index
    %0 = vector.load %arg1[%c0, %c0_0] : memref<24x32xf32, #tpu.memory_space<vmem>>, vector<24x32xf32>
    %c0_1 = arith.constant 0 : index
    %c0_2 = arith.constant 0 : index
    %1 = vector.load %arg2[%c0_1, %c0_2] : memref<8x32xf32, #tpu.memory_space<vmem>>, vector<8x32xf32>
    %cst = arith.constant dense<0.000000e+00> : vector<24x8xf32>
    %2 = tpu.matmul %0, %1, %cst {dimension_numbers = #tpu.dot_dimension_numbers<[1], [1], [0], [0], [0, 0, 1, 0], [], []>} : vector<24x32xf32>, vector<8x32xf32>, vector<24x8xf32> -> vector<24x8xf32>
    %c0_3 = arith.constant 0 : index
    %c0_4 = arith.constant 0 : index
    %3 = vector.load %arg3[%c0_3, %c0_4] : memref<1x8xf32, #tpu.memory_space<vmem>>, vector<1x8xf32>
    %4 = vector.broadcast %3 : vector<1x8xf32> to vector<24x8xf32>
    %5 = arith.addf %2, %4 : vector<24x8xf32>
    %c0_5 = arith.constant 0 : index
    %c0_6 = arith.constant 0 : index
    %6 = vector.load %arg4[%c0_5, %c0_6] : memref<24x8xf32, #tpu.memory_space<vmem>>, vector<24x8xf32>
    tpu.vector_store %arg4[%c0_5, %c0_6], %5 {strides = array<i32>} : memref<24x8xf32, #tpu.memory_space<vmem>>, vector<24x8xf32>,
    return
  }
  func.func @transform_0(%arg0: i32) -> (i32, i32) {
    %c0_i32 = arith.constant 0 : i32
    %c0_i32_0 = arith.constant 0 : i32
    return %arg0, %c0_i32 : i32, i32
  }
  func.func @transform_1(%arg0: i32) -> (i32, i32) {
    %c0_i32 = arith.constant 0 : i32
    %c0_i32_0 = arith.constant 0 : i32
    %c0_i32_1 = arith.constant 0 : i32
    return %c0_i32, %c0_i32_0 : i32, i32
  }
  func.func @transform_2(%arg0: i32) -> (i32, i32) {
    %c0_i32 = arith.constant 0 : i32
    %c0_i32_0 = arith.constant 0 : i32
    %c0_i32_1 = arith.constant 0 : i32
    return %c0_i32, %c0_i32_0 : i32, i32
  }
  func.func @transform_3(%arg0: i32) -> (i32, i32) {
    %c0_i32 = arith.constant 0 : i32
    %c0_i32_0 = arith.constant 0 : i32
    return %arg0, %c0_i32 : i32, i32
  }
}

</mosaic_0001>

<bundles_post_ra>
// kernel: tpu_custom_call.1
= control target key start
LH: loop header
LB: loop body
LE: loop exit
PB: predicated region body
PF: predicated region fallthrough
CT: control target
= control target key end

     0   :  { %8 = vsyncpa [#allocation3], 0  ;;  %s270_s0 = inlined_call_operand.hbm [shape: f32[24,32], index: 0, kind: input, shape index: {}]   ;;  %s271_s1 = inlined_call_operand.hbm [shape: f32[8,32], index: 1, kind: input, shape index: {}]   ;;  %s272_s2 = inlined_call_operand.vmem [shape: f32[1,8], index: 2, kind: input, shape index: {}]   ;;  %s273_s3 = inlined_call_operand.vmem [shape: f32[24,8], index: 3, kind: output, shape index: {}]  }
   0x1   :  { %9 = vsyncpa [#allocation5], 0  ;;  %s226_s12 = smov [#allocation2]  }
   0x2   :  { %s15_s13 = sshll.u32 %s226_s12, 4  ;;  %s16_s13 = int_to_ptr.vmem [resolvable:$true] %s15_s13 }
   0x3   :  { %s190_s14 = scalar_lea.vmem %s16_s13, 384  ;;  %p195_p1 = scmp.lt.s32.totalorder %s16_s13, %s16_s13 }
   0x4   :  { %p191_p0 = scmp.ne.s32.totalorder %s16_s13, %s190_s14  ;;  %p196_p2 = scmp.lt.s32.totalorder %s190_s14, %s190_s14 }
   0x6   :  { %p197_p3 = por %p196_p2, %p195_p1 }
   0x8   :  { %p198_p4 = pnand %p197_p3, %p191_p0 }
   0xa   :  { %201 = shalt.err (!%p198_p4)
}
   0xb   :  { %s227_s15 = smov 128   ;;  %s228_s16 = smov 8  }
   0xc   :  { %21 = dma.hbm_to_vmem [thread:$0]  %s270_s0, 384, %s16_s13, [#allocation3], %s227_s15, %s227_s15, %s228_s16  }
   0xd   :  { %s229_s19 = smov [#allocation4]  }
   0xe   :  { %s28_s20 = sshll.u32 %s229_s19, 4  ;;  %s29_s20 = int_to_ptr.vmem [resolvable:$true] %s28_s20 }
   0xf   :  { %s210_s21 = scalar_lea.vmem %s29_s20, 128  ;;  %p215_p6 = scmp.lt.s32.totalorder %s29_s20, %s29_s20 }
  0x10   :  { %p211_p5 = scmp.ne.s32.totalorder %s29_s20, %s210_s21  ;;  %p216_p7 = scmp.lt.s32.totalorder %s210_s21, %s210_s21 }
  0x12   :  { %p217_p8 = por %p216_p7, %p215_p6 }
  0x14   :  { %p218_p9 = pnand %p217_p8, %p211_p5 }
  0x16   :  { %221 = shalt.err (!%p218_p9)
}
  0x17   :  { %31 = dma.hbm_to_vmem [thread:$0]  %s271_s1, 128, %s29_s20, [#allocation5]  }
  0x18   :  { %222 = dma.done.wait [#allocation3], 384  }
  0x19   :  { %223 = vsyncadd [#allocation3], 4294966912 }
  0x1a   :  { %224 = dma.done.wait [#allocation5], 128  }
  0x1b   :  { %225 = vsyncadd [#allocation5], 4294967168  ;;  %v230_v0 = vmov 0.0   ;;  %vm231_vm0 = vmmov 0   ;;  %vm51_vm1 = vcmask 261120   ;;  %v43_v1 = vld [vmem:[#allocation4] sm:$0xff] }
  0x1c   :  { %174 = vmatprep.subr.mxu1 %v230_v0  ;;  %163 = vmatprep.subr.mxu0 %v230_v0  ;;  %v41_v2 = vld [vmem:[#allocation2 + $0x8] sm:$0xff]  ;;  %v40_v3 = vld [vmem:[#allocation2] sm:$0xff]  ;;  %v42_v4 = vld [vmem:[#allocation2 + $0x10] sm:$0xff]  ;;  %vm144_vm2 = vcmask 64512  }
  0x1d   :  { %168 = vmatprep.mubr.msk.f32.mxu1 %vm231_vm0, %v230_v0  ;;  %165 = vmatprep.mubr.msk.f32.mxu0 %vm231_vm0, %v230_v0  ;;  %v154_v5 = vld [vmem:[%s272_s2] ss:$0 sm:$0xff] }
  0x1e   :  { %175 = vmatpush3.xpose.msk.msra.mxu1 %vm51_vm1, %v43_v1  ;;  %164 = vmatpush3.xpose.msk.msra.mxu0 %vm51_vm1, %v43_v1 }
  0x21   :  { %169 = vmatmul.mubr.msk.f32.vlgmr.msra.gmra.mxu1 %vm51_vm1, %v41_v2  ;;  %166 = vmatmul.mubr.msk.f32.vlgmr.msra.gmra.mxu0 %vm51_vm1, %v40_v3 }
  0x22   :  { %171 = vmatprep.mubr.msk.f32.mxu1 %vm231_vm0, %v230_v0 }
  0x25   :  { %172 = vmatmul.mubr.msk.f32.gmra.mxu1 %vm51_vm1, %v42_v4 }
  0xe1   :  { %v135_v6 = vpop.f32.mrf.mxu1  ;;  %v130_v7 = vpop.f32.mrf.mxu0 }
  0xe2   :  { %v136_v8 = vadd.f32 %v154_v5, %v135_v6  ;;  %v131_v9 = vadd.f32 %v154_v5, %v130_v7 }
  0xe3   :  { %v170_v10 = vpop.f32.mrf.mxu1  ;;  %v167_v11 = vpop.f32.mrf.mxu0 }
  0xe4   :  { %146 = vst.msk [vmem:[%s273_s3 + $0x8] sm:$0xff] %vm144_vm2, %v136_v8  ;;  %145 = vst.msk [vmem:[%s273_s3] sm:$0xff] %vm144_vm2, %v131_v9 }
  0xe5   :  { %v140_v12 = vpop.f32.mrf.mxu1 }
  0xe6   :  { %v141_v13 = vadd.f32 %v154_v5, %v140_v12 }
  0xe7   :  { %v173_v14 = vpop.f32.mrf.mxu1 }
  0xe8   :  { %147 = vst.msk [vmem:[%s273_s3 + $0x10] sm:$0xff] %vm144_vm2, %v141_v13 }
  0xe9   :  { %152 = vsyncpa [#allocation3], 1 }
  0xea   :  { %153 = vsyncpa [#allocation5], 1 }

</bundles_post_ra>
